<compile_context>
chip_gen: v7x
topology: tpu7x:2x2x1
jax: 0.10.0
libtpu: 0.0.40
codegen_flags: <defaults>
</compile_context>

<pallas_src>
import functools

import jax
import jax.numpy as jnp
from jax import lax
from jax.experimental import pallas as pl
from jax.experimental.pallas import tpu as pltpu

L_COORD = 5.0       # lambda_coord default
L_NOOBJ = 0.5       # lambda_noobj default
NUM_CLASSES = 20
NUM_BOXES = 2
NUM_CH = NUM_BOXES * 5 + NUM_CLASSES    # 30 channels per cell
CH_PAD = 32                             # channel rows padded to a sublane multiple
LANES = 128


def _round_up(x, m):
    return ((x + m - 1) // m) * m


# ----------------------------------------------------------------------------
# Pallas kernel: fused masked MSE over dense (row_blk, 128) channel tiles.
# Grid axis 0 walks the cell dimension; a (1,1) VMEM scratch accumulates the
# per-block sums; the (1,1) output is written once at the last step.
# Channel rows:  0..4 box0 [conf,x,y,w,h] | 5..9 box1 | 10..29 classes | 30,31 pad
# ----------------------------------------------------------------------------
def _yolo_loss_kernel(p_ref, t_ref, out_ref, acc_ref, *, inv_bs):
    step = pl.program_id(0)

    @pl.when(step == 0)
    def _init():
        acc_ref[...] = jnp.zeros_like(acc_ref)

    # masks and per-box weights via selects (no bool->float converts)
    tconf0 = t_ref[0]                       # (row_blk, 128) dense tiles
    tconf1 = t_ref[5]
    conf_sum = tconf0 + tconf1
    obj = conf_sum == 1.0                   # exactly one assigned box
    noobj = conf_sum == 0.0                 # empty cell (zero padding lands here)
    resp0 = jnp.logical_and(obj, tconf0 == 1.0)
    resp1 = jnp.logical_and(obj, tconf1 == 1.0)

    w0 = jnp.where(noobj, L_NOOBJ, jnp.where(resp0, 1.0, 0.0))
    w1 = jnp.where(noobj, L_NOOBJ, jnp.where(resp1, 1.0, 0.0))
    c0 = jnp.where(resp0, L_COORD, 0.0)
    c1 = jnp.where(resp1, L_COORD, 0.0)

    # confidence terms (noobj: weight L_NOOBJ; responsible box: weight 1)
    d0 = p_ref[0] - tconf0
    d1 = p_ref[5] - tconf1
    cell = w0 * d0 * d0 + w1 * d1 * d1

    # coordinate terms (responsible boxes only).  The where() keeps sqrt NaNs
    # from un-selected cells out of the forward accumulation.
    # TODO(synk): jax.grad through this kernel would hit the where-of-NaN
    # gradient pitfall for negative w/h predictions (forward matches PyTorch).
    dx0 = p_ref[1] - t_ref[1]
    dy0 = p_ref[2] - t_ref[2]
    dw0 = jnp.where(resp0, jnp.sqrt(p_ref[3]) - jnp.sqrt(t_ref[3]), 0.0)
    dh0 = jnp.where(resp0, jnp.sqrt(p_ref[4]) - jnp.sqrt(t_ref[4]), 0.0)
    cell = cell + c0 * (dx0 * dx0 + dy0 * dy0 + dw0 * dw0 + dh0 * dh0)

    dx1 = p_ref[6] - t_ref[6]
    dy1 = p_ref[7] - t_ref[7]
    dw1 = jnp.where(resp1, jnp.sqrt(p_ref[8]) - jnp.sqrt(t_ref[8]), 0.0)
    dh1 = jnp.where(resp1, jnp.sqrt(p_ref[9]) - jnp.sqrt(t_ref[9]), 0.0)
    cell = cell + c1 * (dx1 * dx1 + dy1 * dy1 + dw1 * dw1 + dh1 * dh1)

    # classification term on object cells, summed with VALU adds
    cls_sq = jnp.zeros_like(cell)
    for c in range(10, 10 + NUM_CLASSES):
        dc = p_ref[c] - t_ref[c]
        cls_sq = cls_sq + dc * dc
    cell = cell + jnp.where(obj, cls_sq, 0.0)

    # exactly one cross-lane reduction per block
    acc_ref[...] += jnp.sum(cell)

    @pl.when(step == pl.num_programs(0) - 1)
    def _finalize():
        out_ref[...] = acc_ref[...] * inv_bs


# ----------------------------------------------------------------------------
# Plain-JAX glue: vectorised build_target.
# Per-object IoU box assignment is embarrassingly parallel; the PyTorch
# "later object overwrites earlier" semantics are reproduced with a
# scatter-max over the object index per (cell, box) slot, then one gather.
# Returns the target channels already channel-major.
# ----------------------------------------------------------------------------
def _build_target_packed(target, pred_boxes_flat, grids, n_cells):
    """target: (BS, MaxObj, 5) [x1,y1,x2,y2,cls]; pred_boxes_flat: (n_cells, 10).

    Returns:
      box_cm: (10, n_cells)  [conf0,x0,y0,w0,h0, conf1,x1,y1,w1,h1]
      clc_cm: (20, n_cells)
    """
    # TODO(synk): the data-dependent per-object assignment/scatter stays in
    # plain JAX (no clean in-kernel Pallas scatter for this pattern).
    bs, maxobj, _ = target.shape
    g = jnp.float32(grids)

    x1 = target[..., 0]
    y1 = target[..., 1]
    x2 = target[..., 2]
    y2 = target[..., 3]
    cls_i = target[..., 4].astype(jnp.int32)
    valid = jnp.sum(target, axis=-1) != 0.0                    # (BS, MaxObj)

    w = x2 - x1
    h = y2 - y1
    cx = g * (x1 + x2) * 0.5
    cy = g * (y1 + y2) * 0.5
    gx = cx.astype(jnp.int32)                                  # trunc == floor (coords >= 0)
    gy = cy.astype(jnp.int32)
    offx = cx - gx.astype(jnp.float32)
    offy = cy - gy.astype(jnp.float32)

    b_idx = jnp.arange(bs, dtype=jnp.int32)[:, None]
    cell = (b_idx * grids + gy) * grids + gx                   # (BS, MaxObj) flat cell idx

    # IoU between the 2 predicted boxes of the assigned cell and the GT box
    cell_pred = pred_boxes_flat[cell].reshape(bs, maxobj, NUM_BOXES, 5)
    px = cell_pred[..., 1] / g
    py = cell_pred[..., 2] / g
    pw = cell_pred[..., 3]
    ph = cell_pred[..., 4]
    px1 = px - 0.5 * pw
    py1 = py - 0.5 * ph
    px2 = px + 0.5 * pw
    py2 = py + 0.5 * ph

    tx1 = (offx / g - 0.5 * w)[..., None]
    ty1 = (offy / g - 0.5 * h)[..., None]
    tx2 = (offx / g + 0.5 * w)[..., None]
    ty2 = (offy / g + 0.5 * h)[..., None]

    iw = jnp.maximum(jnp.minimum(px2, tx2) - jnp.maximum(px1, tx1), 0.0)
    ih = jnp.maximum(jnp.minimum(py2, ty2) - jnp.maximum(py1, ty1), 0.0)
    inter = iw * ih
    area_p = (px2 - px1) * (py2 - py1)
    area_t = (tx2 - tx1) * (ty2 - ty1)
    iou = inter / (area_p + area_t - inter)                    # (BS, MaxObj, 2)
    max_index = jnp.argmax(iou, axis=-1).astype(jnp.int32)     # (BS, MaxObj)

    # winner per (cell, box) slot: last valid object in write order wins
    n_slots = 2 * n_cells
    slot = jnp.where(valid, cell * 2 + max_index, n_slots)     # dummy slot for padding
    prio = jnp.broadcast_to(
        jnp.arange(1, maxobj + 1, dtype=jnp.int32)[None, :], (bs, maxobj))
    winner = jnp.zeros((n_slots + 1,), jnp.int32)
    winner = winner.at[slot.reshape(-1)].max(prio.reshape(-1))
    winner = winner[:n_slots]                                  # (2*n_cells,)

    # gather the winning object's row [conf=1, offx, offy, w, h]
    obj_rows = jnp.stack([jnp.ones_like(offx), offx, offy, w, h], axis=-1)
    obj_rows = jnp.concatenate(
        [obj_rows.reshape(bs * maxobj, 5), jnp.zeros((1, 5), jnp.float32)], axis=0)
    slot_b = jnp.arange(n_slots, dtype=jnp.int32) // jnp.int32(2 * grids * grids)
    win_obj = jnp.where(winner > 0, slot_b * maxobj + winner - 1, bs * maxobj)
    vals = obj_rows[win_obj]                                   # (2*n_cells, 5)
    box_cm = vals.reshape(n_cells, NUM_BOXES, 5).transpose(1, 2, 0).reshape(
        NUM_BOXES * 5, n_cells)

    # class one-hot (order independent -> scatter-max of 1), channel-major
    ccell = jnp.where(valid, cell, n_cells)                    # dummy column for padding
    cidx = cls_i * (n_cells + 1) + ccell
    clc = jnp.zeros((NUM_CLASSES * (n_cells + 1),), jnp.float32)
    clc = clc.at[cidx.reshape(-1)].max(1.0)
    clc_cm = clc.reshape(NUM_CLASSES, n_cells + 1)[:, :n_cells]

    return box_cm, clc_cm


# ----------------------------------------------------------------------------
# Wrapper: build channel-major targets, pack (32, rows, 128) slabs, run the
# gridded Pallas reduction.
# ----------------------------------------------------------------------------
def yolo_loss_pallas(pred, target):
    pred = pred.astype(jnp.float32)
    target = target.astype(jnp.float32)
    bs, grids = pred.shape[0], pred.shape[2]
    n_cells = bs * grids * grids

    # (channel, sublane-row, lane) packing: row = cell // 128, lane = cell % 128
    n_rows = -(-n_cells // LANES)
    row_blk = min(64, _round_up(n_rows, 8))       # <=1 MiB f32 per input block
    n_row_blocks = -(-n_rows // row_blk)
    n_rows_pad = n_row_blocks * row_blk
    n_pad = n_rows_pad * LANES

    pred2d = pred.reshape(n_cells, NUM_CH)

    # data-dependent box assignment (plain JAX; one gather + two scatter-max)
    box_cm, clc_cm = _build_target_packed(
        target, pred2d[:, : NUM_BOXES * 5], grids, n_cells)

    # assemble both operands channel-major into zero-padded slabs
    # (zero padding contributes exactly 0 to every loss term)
    pred_slab = jnp.zeros((CH_PAD, n_pad), jnp.float32)
    pred_slab = lax.dynamic_update_slice(pred_slab, pred2d.T, (0, 0))
    tgt_slab = jnp.zeros((CH_PAD, n_pad), jnp.float32)
    tgt_slab = lax.dynamic_update_slice(tgt_slab, box_cm, (0, 0))
    tgt_slab = lax.dynamic_update_slice(tgt_slab, clc_cm, (NUM_BOXES * 5, 0))
    pred_slab = pred_slab.reshape(CH_PAD, n_rows_pad, LANES)
    tgt_slab = tgt_slab.reshape(CH_PAD, n_rows_pad, LANES)

    block = (CH_PAD, row_blk, LANES)
    in_spec = pl.BlockSpec(block, lambda i: (0, i, 0))
    kernel = functools.partial(_yolo_loss_kernel, inv_bs=1.0 / bs)

    loss = pl.pallas_call(
        kernel,
        out_shape=jax.ShapeDtypeStruct((1, 1), jnp.float32),
        grid=(n_row_blocks,),
        in_specs=[in_spec, in_spec],
        out_specs=pl.BlockSpec((1, 1), lambda i: (0, 0)),
        scratch_shapes=[pltpu.VMEM((1, 1), jnp.float32)],
        compiler_params=pltpu.CompilerParams(
            dimension_semantics=("arbitrary",)),
    )(pred_slab, tgt_slab)
    return loss[0, 0]


if __name__ == "__main__":
    BS, S, MAXOBJ = 2, 7, 3

    key = jax.random.PRNGKey(0)
    k_pred, k_ctr, k_sz, k_cls = jax.random.split(key, 4)

    # predictions: strictly positive so sqrt(w), sqrt(h) are well-defined
    pred = jax.random.uniform(k_pred, (BS, S, S, NUM_BOXES * 5 + NUM_CLASSES),
                              dtype=jnp.float32, minval=0.05, maxval=0.95)

    # ground-truth boxes: [x1, y1, x2, y2, class] in 0..1
    centers = jax.random.uniform(k_ctr, (BS, MAXOBJ, 2), dtype=jnp.float32,
                                 minval=0.25, maxval=0.75)
    sizes = jax.random.uniform(k_sz, (BS, MAXOBJ, 2), dtype=jnp.float32,
                               minval=0.10, maxval=0.30)
    cls_ids = jax.random.randint(k_cls, (BS, MAXOBJ, 1), 0, NUM_CLASSES).astype(jnp.float32)
    target = jnp.concatenate(
        [centers - 0.5 * sizes, centers + 0.5 * sizes, cls_ids], axis=-1)
    # mark last object of second image as padding (all zeros -> skipped, like PyTorch)
    target = target.at[1, MAXOBJ - 1].set(0.0)

    loss_fn = jax.jit(yolo_loss_pallas)
    loss = loss_fn(pred, target)
    jax.block_until_ready(loss)
    assert jnp.isfinite(loss)
    print("KERNEL_OK")
</pallas_src>

<mosaic_0001>
module attributes {stable_mosaic.version = 11 : i64} {
  func.func @_yolo_loss_kernel(%arg0: i32, %arg1: memref<32x8x128xf32, #tpu.memory_space<vmem>>, %arg2: memref<32x8x128xf32, #tpu.memory_space<vmem>>, %arg3: memref<1x1xf32, #tpu.memory_space<vmem>>, %arg4: memref<1x1xf32, #tpu.memory_space<vmem>>) attributes {dimension_semantics = [#tpu.dimension_semantics<arbitrary>], iteration_bounds = array<i64: 1>, scalar_prefetch = 0 : i64, scratch_operands = 1 : i64, tpu.core_type = #tpu.core_type<tc>, window_params = [{transform_indices = @transform_0, window_bounds = array<i64: 32, 8, 128>}, {transform_indices = @transform_1, window_bounds = array<i64: 32, 8, 128>}, {pipeline_mode = #tpu.pipeline_mode<synchronous>, transform_indices = @transform_2, window_bounds = array<i64: 1, 1>}]} {
    %c0_i32 = arith.constant 0 : i32
    %0 = arith.cmpi eq, %arg0, %c0_i32 : i32
    %1 = arith.extui %0 : i1 to i32
    %c0_i32_0 = arith.constant 0 : i32
    %2 = arith.cmpi ne, %1, %c0_i32_0 : i32
    scf.if %2 {
      %cst_177 = arith.constant 0.000000e+00 : f32
      %274 = vector.broadcast %cst_177 : f32 to vector<1x1xf32>
      %c0_178 = arith.constant 0 : index
      %c0_179 = arith.constant 0 : index
      %275 = vector.load %arg4[%c0_178, %c0_179] : memref<1x1xf32, #tpu.memory_space<vmem>>, vector<1x1xf32>
      tpu.vector_store %arg4[%c0_178, %c0_179], %274 {strides = array<i32>} : memref<1x1xf32, #tpu.memory_space<vmem>>, vector<1x1xf32>,
    } else {
    }
    %c0 = arith.constant 0 : index
    %c0_1 = arith.constant 0 : index
    %c0_2 = arith.constant 0 : index
    %3 = vector.load %arg2[%c0, %c0_1, %c0_2] : memref<32x8x128xf32, #tpu.memory_space<vmem>>, vector<1x8x128xf32>
    %4 = vector.shape_cast %3 : vector<1x8x128xf32> to vector<8x128xf32>
    %c5 = arith.constant 5 : index
    %c0_3 = arith.constant 0 : index
    %c0_4 = arith.constant 0 : index
    %5 = vector.load %arg2[%c5, %c0_3, %c0_4] : memref<32x8x128xf32, #tpu.memory_space<vmem>>, vector<1x8x128xf32>
    %6 = vector.shape_cast %5 : vector<1x8x128xf32> to vector<8x128xf32>
    %7 = arith.addf %4, %6 : vector<8x128xf32>
    %cst = arith.constant 1.000000e+00 : f32
    %8 = vector.broadcast %cst : f32 to vector<8x128xf32>
    %9 = arith.cmpf oeq, %7, %8 : vector<8x128xf32>
    %cst_5 = arith.constant 0.000000e+00 : f32
    %10 = vector.broadcast %cst_5 : f32 to vector<8x128xf32>
    %11 = arith.cmpf oeq, %7, %10 : vector<8x128xf32>
    %cst_6 = arith.constant 1.000000e+00 : f32
    %12 = vector.broadcast %cst_6 : f32 to vector<8x128xf32>
    %13 = arith.cmpf oeq, %4, %12 : vector<8x128xf32>
    %14 = arith.andi %9, %13 : vector<8x128xi1>
    %cst_7 = arith.constant 1.000000e+00 : f32
    %15 = vector.broadcast %cst_7 : f32 to vector<8x128xf32>
    %16 = arith.cmpf oeq, %6, %15 : vector<8x128xf32>
    %17 = arith.andi %9, %16 : vector<8x128xi1>
    %cst_8 = arith.constant 1.000000e+00 : f32
    %cst_9 = arith.constant 0.000000e+00 : f32
    %18 = vector.broadcast %cst_8 : f32 to vector<8x128xf32>
    %19 = vector.broadcast %cst_9 : f32 to vector<8x128xf32>
    %20 = arith.select %14, %18, %19 : vector<8x128xi1>, vector<8x128xf32>
    %cst_10 = arith.constant 5.000000e-01 : f32
    %21 = vector.broadcast %cst_10 : f32 to vector<8x128xf32>
    %22 = arith.select %11, %21, %20 : vector<8x128xi1>, vector<8x128xf32>
    %cst_11 = arith.constant 1.000000e+00 : f32
    %cst_12 = arith.constant 0.000000e+00 : f32
    %23 = vector.broadcast %cst_11 : f32 to vector<8x128xf32>
    %24 = vector.broadcast %cst_12 : f32 to vector<8x128xf32>
    %25 = arith.select %17, %23, %24 : vector<8x128xi1>, vector<8x128xf32>
    %cst_13 = arith.constant 5.000000e-01 : f32
    %26 = vector.broadcast %cst_13 : f32 to vector<8x128xf32>
    %27 = arith.select %11, %26, %25 : vector<8x128xi1>, vector<8x128xf32>
    %cst_14 = arith.constant 5.000000e+00 : f32
    %cst_15 = arith.constant 0.000000e+00 : f32
    %28 = vector.broadcast %cst_14 : f32 to vector<8x128xf32>
    %29 = vector.broadcast %cst_15 : f32 to vector<8x128xf32>
    %30 = arith.select %14, %28, %29 : vector<8x128xi1>, vector<8x128xf32>
    %cst_16 = arith.constant 5.000000e+00 : f32
    %cst_17 = arith.constant 0.000000e+00 : f32
    %31 = vector.broadcast %cst_16 : f32 to vector<8x128xf32>
    %32 = vector.broadcast %cst_17 : f32 to vector<8x128xf32>
    %33 = arith.select %17, %31, %32 : vector<8x128xi1>, vector<8x128xf32>
    %c0_18 = arith.constant 0 : index
    %c0_19 = arith.constant 0 : index
    %c0_20 = arith.constant 0 : index
    %34 = vector.load %arg1[%c0_18, %c0_19, %c0_20] : memref<32x8x128xf32, #tpu.memory_space<vmem>>, vector<1x8x128xf32>
    %35 = vector.shape_cast %34 : vector<1x8x128xf32> to vector<8x128xf32>
    %36 = arith.subf %35, %4 : vector<8x128xf32>
    %c5_21 = arith.constant 5 : index
    %c0_22 = arith.constant 0 : index
    %c0_23 = arith.constant 0 : index
    %37 = vector.load %arg1[%c5_21, %c0_22, %c0_23] : memref<32x8x128xf32, #tpu.memory_space<vmem>>, vector<1x8x128xf32>
    %38 = vector.shape_cast %37 : vector<1x8x128xf32> to vector<8x128xf32>
    %39 = arith.subf %38, %6 : vector<8x128xf32>
    %40 = arith.mulf %22, %36 : vector<8x128xf32>
    %41 = arith.mulf %40, %36 : vector<8x128xf32>
    %42 = arith.mulf %27, %39 : vector<8x128xf32>
    %43 = arith.mulf %42, %39 : vector<8x128xf32>
    %44 = arith.addf %41, %43 : vector<8x128xf32>
    %c1 = arith.constant 1 : index
    %c0_24 = arith.constant 0 : index
    %c0_25 = arith.constant 0 : index
    %45 = vector.load %arg1[%c1, %c0_24, %c0_25] : memref<32x8x128xf32, #tpu.memory_space<vmem>>, vector<1x8x128xf32>
    %46 = vector.shape_cast %45 : vector<1x8x128xf32> to vector<8x128xf32>
    %c1_26 = arith.constant 1 : index
    %c0_27 = arith.constant 0 : index
    %c0_28 = arith.constant 0 : index
    %47 = vector.load %arg2[%c1_26, %c0_27, %c0_28] : memref<32x8x128xf32, #tpu.memory_space<vmem>>, vector<1x8x128xf32>
    %48 = vector.shape_cast %47 : vector<1x8x128xf32> to vector<8x128xf32>
    %49 = arith.subf %46, %48 : vector<8x128xf32>
    %c2 = arith.constant 2 : index
    %c0_29 = arith.constant 0 : index
    %c0_30 = arith.constant 0 : index
    %50 = vector.load %arg1[%c2, %c0_29, %c0_30] : memref<32x8x128xf32, #tpu.memory_space<vmem>>, vector<1x8x128xf32>
    %51 = vector.shape_cast %50 : vector<1x8x128xf32> to vector<8x128xf32>
    %c2_31 = arith.constant 2 : index
    %c0_32 = arith.constant 0 : index
    %c0_33 = arith.constant 0 : index
    %52 = vector.load %arg2[%c2_31, %c0_32, %c0_33] : memref<32x8x128xf32, #tpu.memory_space<vmem>>, vector<1x8x128xf32>
    %53 = vector.shape_cast %52 : vector<1x8x128xf32> to vector<8x128xf32>
    %54 = arith.subf %51, %53 : vector<8x128xf32>
    %c3 = arith.constant 3 : index
    %c0_34 = arith.constant 0 : index
    %c0_35 = arith.constant 0 : index
    %55 = vector.load %arg1[%c3, %c0_34, %c0_35] : memref<32x8x128xf32, #tpu.memory_space<vmem>>, vector<1x8x128xf32>
    %56 = vector.shape_cast %55 : vector<1x8x128xf32> to vector<8x128xf32>
    %57 = math.sqrt %56 : vector<8x128xf32>
    %c3_36 = arith.constant 3 : index
    %c0_37 = arith.constant 0 : index
    %c0_38 = arith.constant 0 : index
    %58 = vector.load %arg2[%c3_36, %c0_37, %c0_38] : memref<32x8x128xf32, #tpu.memory_space<vmem>>, vector<1x8x128xf32>
    %59 = vector.shape_cast %58 : vector<1x8x128xf32> to vector<8x128xf32>
    %60 = math.sqrt %59 : vector<8x128xf32>
    %61 = arith.subf %57, %60 : vector<8x128xf32>
    %cst_39 = arith.constant 0.000000e+00 : f32
    %62 = vector.broadcast %cst_39 : f32 to vector<8x128xf32>
    %63 = arith.select %14, %61, %62 : vector<8x128xi1>, vector<8x128xf32>
    %c4 = arith.constant 4 : index
    %c0_40 = arith.constant 0 : index
    %c0_41 = arith.constant 0 : index
    %64 = vector.load %arg1[%c4, %c0_40, %c0_41] : memref<32x8x128xf32, #tpu.memory_space<vmem>>, vector<1x8x128xf32>
    %65 = vector.shape_cast %64 : vector<1x8x128xf32> to vector<8x128xf32>
    %66 = math.sqrt %65 : vector<8x128xf32>
    %c4_42 = arith.constant 4 : index
    %c0_43 = arith.constant 0 : index
    %c0_44 = arith.constant 0 : index
    %67 = vector.load %arg2[%c4_42, %c0_43, %c0_44] : memref<32x8x128xf32, #tpu.memory_space<vmem>>, vector<1x8x128xf32>
    %68 = vector.shape_cast %67 : vector<1x8x128xf32> to vector<8x128xf32>
    %69 = math.sqrt %68 : vector<8x128xf32>
    %70 = arith.subf %66, %69 : vector<8x128xf32>
    %cst_45 = arith.constant 0.000000e+00 : f32
    %71 = vector.broadcast %cst_45 : f32 to vector<8x128xf32>
    %72 = arith.select %14, %70, %71 : vector<8x128xi1>, vector<8x128xf32>
    %73 = arith.mulf %49, %49 : vector<8x128xf32>
    %74 = arith.mulf %54, %54 : vector<8x128xf32>
    %75 = arith.addf %73, %74 : vector<8x128xf32>
    %76 = arith.mulf %63, %63 : vector<8x128xf32>
    %77 = arith.addf %75, %76 : vector<8x128xf32>
    %78 = arith.mulf %72, %72 : vector<8x128xf32>
    %79 = arith.addf %77, %78 : vector<8x128xf32>
    %80 = arith.mulf %30, %79 : vector<8x128xf32>
    %81 = arith.addf %44, %80 : vector<8x128xf32>
    %c6 = arith.constant 6 : index
    %c0_46 = arith.constant 0 : index
    %c0_47 = arith.constant 0 : index
    %82 = vector.load %arg1[%c6, %c0_46, %c0_47] : memref<32x8x128xf32, #tpu.memory_space<vmem>>, vector<1x8x128xf32>
    %83 = vector.shape_cast %82 : vector<1x8x128xf32> to vector<8x128xf32>
    %c6_48 = arith.constant 6 : index
    %c0_49 = arith.constant 0 : index
    %c0_50 = arith.constant 0 : index
    %84 = vector.load %arg2[%c6_48, %c0_49, %c0_50] : memref<32x8x128xf32, #tpu.memory_space<vmem>>, vector<1x8x128xf32>
    %85 = vector.shape_cast %84 : vector<1x8x128xf32> to vector<8x128xf32>
    %86 = arith.subf %83, %85 : vector<8x128xf32>
    %c7 = arith.constant 7 : index
    %c0_51 = arith.constant 0 : index
    %c0_52 = arith.constant 0 : index
    %87 = vector.load %arg1[%c7, %c0_51, %c0_52] : memref<32x8x128xf32, #tpu.memory_space<vmem>>, vector<1x8x128xf32>
    %88 = vector.shape_cast %87 : vector<1x8x128xf32> to vector<8x128xf32>
    %c7_53 = arith.constant 7 : index
    %c0_54 = arith.constant 0 : index
    %c0_55 = arith.constant 0 : index
    %89 = vector.load %arg2[%c7_53, %c0_54, %c0_55] : memref<32x8x128xf32, #tpu.memory_space<vmem>>, vector<1x8x128xf32>
    %90 = vector.shape_cast %89 : vector<1x8x128xf32> to vector<8x128xf32>
    %91 = arith.subf %88, %90 : vector<8x128xf32>
    %c8 = arith.constant 8 : index
    %c0_56 = arith.constant 0 : index
    %c0_57 = arith.constant 0 : index
    %92 = vector.load %arg1[%c8, %c0_56, %c0_57] : memref<32x8x128xf32, #tpu.memory_space<vmem>>, vector<1x8x128xf32>
    %93 = vector.shape_cast %92 : vector<1x8x128xf32> to vector<8x128xf32>
    %94 = math.sqrt %93 : vector<8x128xf32>
    %c8_58 = arith.constant 8 : index
    %c0_59 = arith.constant 0 : index
    %c0_60 = arith.constant 0 : index
    %95 = vector.load %arg2[%c8_58, %c0_59, %c0_60] : memref<32x8x128xf32, #tpu.memory_space<vmem>>, vector<1x8x128xf32>
    %96 = vector.shape_cast %95 : vector<1x8x128xf32> to vector<8x128xf32>
    %97 = math.sqrt %96 : vector<8x128xf32>
    %98 = arith.subf %94, %97 : vector<8x128xf32>
    %cst_61 = arith.constant 0.000000e+00 : f32
    %99 = vector.broadcast %cst_61 : f32 to vector<8x128xf32>
    %100 = arith.select %17, %98, %99 : vector<8x128xi1>, vector<8x128xf32>
    %c9 = arith.constant 9 : index
    %c0_62 = arith.constant 0 : index
    %c0_63 = arith.constant 0 : index
    %101 = vector.load %arg1[%c9, %c0_62, %c0_63] : memref<32x8x128xf32, #tpu.memory_space<vmem>>, vector<1x8x128xf32>
    %102 = vector.shape_cast %101 : vector<1x8x128xf32> to vector<8x128xf32>
    %103 = math.sqrt %102 : vector<8x128xf32>
    %c9_64 = arith.constant 9 : index
    %c0_65 = arith.constant 0 : index
    %c0_66 = arith.constant 0 : index
    %104 = vector.load %arg2[%c9_64, %c0_65, %c0_66] : memref<32x8x128xf32, #tpu.memory_space<vmem>>, vector<1x8x128xf32>
    %105 = vector.shape_cast %104 : vector<1x8x128xf32> to vector<8x128xf32>
    %106 = math.sqrt %105 : vector<8x128xf32>
    %107 = arith.subf %103, %106 : vector<8x128xf32>
    %cst_67 = arith.constant 0.000000e+00 : f32
    %108 = vector.broadcast %cst_67 : f32 to vector<8x128xf32>
    %109 = arith.select %17, %107, %108 : vector<8x128xi1>, vector<8x128xf32>
    %110 = arith.mulf %86, %86 : vector<8x128xf32>
    %111 = arith.mulf %91, %91 : vector<8x128xf32>
    %112 = arith.addf %110, %111 : vector<8x128xf32>
    %113 = arith.mulf %100, %100 : vector<8x128xf32>
    %114 = arith.addf %112, %113 : vector<8x128xf32>
    %115 = arith.mulf %109, %109 : vector<8x128xf32>
    %116 = arith.addf %114, %115 : vector<8x128xf32>
    %117 = arith.mulf %33, %116 : vector<8x128xf32>
    %118 = arith.addf %81, %117 : vector<8x128xf32>
    %cst_68 = arith.constant 0.000000e+00 : f32
    %119 = vector.broadcast %cst_68 : f32 to vector<8x128xf32>
    %c10 = arith.constant 10 : index
    %c0_69 = arith.constant 0 : index
    %c0_70 = arith.constant 0 : index
    %120 = vector.load %arg1[%c10, %c0_69, %c0_70] : memref<32x8x128xf32, #tpu.memory_space<vmem>>, vector<1x8x128xf32>
    %121 = vector.shape_cast %120 : vector<1x8x128xf32> to vector<8x128xf32>
    %c10_71 = arith.constant 10 : index
    %c0_72 = arith.constant 0 : index
    %c0_73 = arith.constant 0 : index
    %122 = vector.load %arg2[%c10_71, %c0_72, %c0_73] : memref<32x8x128xf32, #tpu.memory_space<vmem>>, vector<1x8x128xf32>
    %123 = vector.shape_cast %122 : vector<1x8x128xf32> to vector<8x128xf32>
    %124 = arith.subf %121, %123 : vector<8x128xf32>
    %125 = arith.mulf %124, %124 : vector<8x128xf32>
    %126 = arith.addf %119, %125 : vector<8x128xf32>
    %c11 = arith.constant 11 : index
    %c0_74 = arith.constant 0 : index
    %c0_75 = arith.constant 0 : index
    %127 = vector.load %arg1[%c11, %c0_74, %c0_75] : memref<32x8x128xf32, #tpu.memory_space<vmem>>, vector<1x8x128xf32>
    %128 = vector.shape_cast %127 : vector<1x8x128xf32> to vector<8x128xf32>
    %c11_76 = arith.constant 11 : index
    %c0_77 = arith.constant 0 : index
    %c0_78 = arith.constant 0 : index
    %129 = vector.load %arg2[%c11_76, %c0_77, %c0_78] : memref<32x8x128xf32, #tpu.memory_space<vmem>>, vector<1x8x128xf32>
    %130 = vector.shape_cast %129 : vector<1x8x128xf32> to vector<8x128xf32>
    %131 = arith.subf %128, %130 : vector<8x128xf32>
    %132 = arith.mulf %131, %131 : vector<8x128xf32>
    %133 = arith.addf %126, %132 : vector<8x128xf32>
    %c12 = arith.constant 12 : index
    %c0_79 = arith.constant 0 : index
    %c0_80 = arith.constant 0 : index
    %134 = vector.load %arg1[%c12, %c0_79, %c0_80] : memref<32x8x128xf32, #tpu.memory_space<vmem>>, vector<1x8x128xf32>
    %135 = vector.shape_cast %134 : vector<1x8x128xf32> to vector<8x128xf32>
    %c12_81 = arith.constant 12 : index
    %c0_82 = arith.constant 0 : index
    %c0_83 = arith.constant 0 : index
    %136 = vector.load %arg2[%c12_81, %c0_82, %c0_83] : memref<32x8x128xf32, #tpu.memory_space<vmem>>, vector<1x8x128xf32>
    %137 = vector.shape_cast %136 : vector<1x8x128xf32> to vector<8x128xf32>
    %138 = arith.subf %135, %137 : vector<8x128xf32>
    %139 = arith.mulf %138, %138 : vector<8x128xf32>
    %140 = arith.addf %133, %139 : vector<8x128xf32>
    %c13 = arith.constant 13 : index
    %c0_84 = arith.constant 0 : index
    %c0_85 = arith.constant 0 : index
    %141 = vector.load %arg1[%c13, %c0_84, %c0_85] : memref<32x8x128xf32, #tpu.memory_space<vmem>>, vector<1x8x128xf32>
    %142 = vector.shape_cast %141 : vector<1x8x128xf32> to vector<8x128xf32>
    %c13_86 = arith.constant 13 : index
    %c0_87 = arith.constant 0 : index
    %c0_88 = arith.constant 0 : index
    %143 = vector.load %arg2[%c13_86, %c0_87, %c0_88] : memref<32x8x128xf32, #tpu.memory_space<vmem>>, vector<1x8x128xf32>
    %144 = vector.shape_cast %143 : vector<1x8x128xf32> to vector<8x128xf32>
    %145 = arith.subf %142, %144 : vector<8x128xf32>
    %146 = arith.mulf %145, %145 : vector<8x128xf32>
    %147 = arith.addf %140, %146 : vector<8x128xf32>
    %c14 = arith.constant 14 : index
    %c0_89 = arith.constant 0 : index
    %c0_90 = arith.constant 0 : index
    %148 = vector.load %arg1[%c14, %c0_89, %c0_90] : memref<32x8x128xf32, #tpu.memory_space<vmem>>, vector<1x8x128xf32>
    %149 = vector.shape_cast %148 : vector<1x8x128xf32> to vector<8x128xf32>
    %c14_91 = arith.constant 14 : index
    %c0_92 = arith.constant 0 : index
    %c0_93 = arith.constant 0 : index
    %150 = vector.load %arg2[%c14_91, %c0_92, %c0_93] : memref<32x8x128xf32, #tpu.memory_space<vmem>>, vector<1x8x128xf32>
    %151 = vector.shape_cast %150 : vector<1x8x128xf32> to vector<8x128xf32>
    %152 = arith.subf %149, %151 : vector<8x128xf32>
    %153 = arith.mulf %152, %152 : vector<8x128xf32>
    %154 = arith.addf %147, %153 : vector<8x128xf32>
    %c15 = arith.constant 15 : index
    %c0_94 = arith.constant 0 : index
    %c0_95 = arith.constant 0 : index
    %155 = vector.load %arg1[%c15, %c0_94, %c0_95] : memref<32x8x128xf32, #tpu.memory_space<vmem>>, vector<1x8x128xf32>
    %156 = vector.shape_cast %155 : vector<1x8x128xf32> to vector<8x128xf32>
    %c15_96 = arith.constant 15 : index
    %c0_97 = arith.constant 0 : index
    %c0_98 = arith.constant 0 : index
    %157 = vector.load %arg2[%c15_96, %c0_97, %c0_98] : memref<32x8x128xf32, #tpu.memory_space<vmem>>, vector<1x8x128xf32>
    %158 = vector.shape_cast %157 : vector<1x8x128xf32> to vector<8x128xf32>
    %159 = arith.subf %156, %158 : vector<8x128xf32>
    %160 = arith.mulf %159, %159 : vector<8x128xf32>
    %161 = arith.addf %154, %160 : vector<8x128xf32>
    %c16 = arith.constant 16 : index
    %c0_99 = arith.constant 0 : index
    %c0_100 = arith.constant 0 : index
    %162 = vector.load %arg1[%c16, %c0_99, %c0_100] : memref<32x8x128xf32, #tpu.memory_space<vmem>>, vector<1x8x128xf32>
    %163 = vector.shape_cast %162 : vector<1x8x128xf32> to vector<8x128xf32>
    %c16_101 = arith.constant 16 : index
    %c0_102 = arith.constant 0 : index
    %c0_103 = arith.constant 0 : index
    %164 = vector.load %arg2[%c16_101, %c0_102, %c0_103] : memref<32x8x128xf32, #tpu.memory_space<vmem>>, vector<1x8x128xf32>
    %165 = vector.shape_cast %164 : vector<1x8x128xf32> to vector<8x128xf32>
    %166 = arith.subf %163, %165 : vector<8x128xf32>
    %167 = arith.mulf %166, %166 : vector<8x128xf32>
    %168 = arith.addf %161, %167 : vector<8x128xf32>
    %c17 = arith.constant 17 : index
    %c0_104 = arith.constant 0 : index
    %c0_105 = arith.constant 0 : index
    %169 = vector.load %arg1[%c17, %c0_104, %c0_105] : memref<32x8x128xf32, #tpu.memory_space<vmem>>, vector<1x8x128xf32>
    %170 = vector.shape_cast %169 : vector<1x8x128xf32> to vector<8x128xf32>
    %c17_106 = arith.constant 17 : index
    %c0_107 = arith.constant 0 : index
    %c0_108 = arith.constant 0 : index
    %171 = vector.load %arg2[%c17_106, %c0_107, %c0_108] : memref<32x8x128xf32, #tpu.memory_space<vmem>>, vector<1x8x128xf32>
    %172 = vector.shape_cast %171 : vector<1x8x128xf32> to vector<8x128xf32>
    %173 = arith.subf %170, %172 : vector<8x128xf32>
    %174 = arith.mulf %173, %173 : vector<8x128xf32>
    %175 = arith.addf %168, %174 : vector<8x128xf32>
    %c18 = arith.constant 18 : index
    %c0_109 = arith.constant 0 : index
    %c0_110 = arith.constant 0 : index
    %176 = vector.load %arg1[%c18, %c0_109, %c0_110] : memref<32x8x128xf32, #tpu.memory_space<vmem>>, vector<1x8x128xf32>
    %177 = vector.shape_cast %176 : vector<1x8x128xf32> to vector<8x128xf32>
    %c18_111 = arith.constant 18 : index
    %c0_112 = arith.constant 0 : index
    %c0_113 = arith.constant 0 : index
    %178 = vector.load %arg2[%c18_111, %c0_112, %c0_113] : memref<32x8x128xf32, #tpu.memory_space<vmem>>, vector<1x8x128xf32>
    %179 = vector.shape_cast %178 : vector<1x8x128xf32> to vector<8x128xf32>
    %180 = arith.subf %177, %179 : vector<8x128xf32>
    %181 = arith.mulf %180, %180 : vector<8x128xf32>
    %182 = arith.addf %175, %181 : vector<8x128xf32>
    %c19 = arith.constant 19 : index
    %c0_114 = arith.constant 0 : index
    %c0_115 = arith.constant 0 : index
    %183 = vector.load %arg1[%c19, %c0_114, %c0_115] : memref<32x8x128xf32, #tpu.memory_space<vmem>>, vector<1x8x128xf32>
    %184 = vector.shape_cast %183 : vector<1x8x128xf32> to vector<8x128xf32>
    %c19_116 = arith.constant 19 : index
    %c0_117 = arith.constant 0 : index
    %c0_118 = arith.constant 0 : index
    %185 = vector.load %arg2[%c19_116, %c0_117, %c0_118] : memref<32x8x128xf32, #tpu.memory_space<vmem>>, vector<1x8x128xf32>
    %186 = vector.shape_cast %185 : vector<1x8x128xf32> to vector<8x128xf32>
    %187 = arith.subf %184, %186 : vector<8x128xf32>
    %188 = arith.mulf %187, %187 : vector<8x128xf32>
    %189 = arith.addf %182, %188 : vector<8x128xf32>
    %c20 = arith.constant 20 : index
    %c0_119 = arith.constant 0 : index
    %c0_120 = arith.constant 0 : index
    %190 = vector.load %arg1[%c20, %c0_119, %c0_120] : memref<32x8x128xf32, #tpu.memory_space<vmem>>, vector<1x8x128xf32>
    %191 = vector.shape_cast %190 : vector<1x8x128xf32> to vector<8x128xf32>
    %c20_121 = arith.constant 20 : index
    %c0_122 = arith.constant 0 : index
    %c0_123 = arith.constant 0 : index
    %192 = vector.load %arg2[%c20_121, %c0_122, %c0_123] : memref<32x8x128xf32, #tpu.memory_space<vmem>>, vector<1x8x128xf32>
    %193 = vector.shape_cast %192 : vector<1x8x128xf32> to vector<8x128xf32>
    %194 = arith.subf %191, %193 : vector<8x128xf32>
    %195 = arith.mulf %194, %194 : vector<8x128xf32>
    %196 = arith.addf %189, %195 : vector<8x128xf32>
    %c21 = arith.constant 21 : index
    %c0_124 = arith.constant 0 : index
    %c0_125 = arith.constant 0 : index
    %197 = vector.load %arg1[%c21, %c0_124, %c0_125] : memref<32x8x128xf32, #tpu.memory_space<vmem>>, vector<1x8x128xf32>
    %198 = vector.shape_cast %197 : vector<1x8x128xf32> to vector<8x128xf32>
    %c21_126 = arith.constant 21 : index
    %c0_127 = arith.constant 0 : index
    %c0_128 = arith.constant 0 : index
    %199 = vector.load %arg2[%c21_126, %c0_127, %c0_128] : memref<32x8x128xf32, #tpu.memory_space<vmem>>, vector<1x8x128xf32>
    %200 = vector.shape_cast %199 : vector<1x8x128xf32> to vector<8x128xf32>
    %201 = arith.subf %198, %200 : vector<8x128xf32>
    %202 = arith.mulf %201, %201 : vector<8x128xf32>
    %203 = arith.addf %196, %202 : vector<8x128xf32>
    %c22 = arith.constant 22 : index
    %c0_129 = arith.constant 0 : index
    %c0_130 = arith.constant 0 : index
    %204 = vector.load %arg1[%c22, %c0_129, %c0_130] : memref<32x8x128xf32, #tpu.memory_space<vmem>>, vector<1x8x128xf32>
    %205 = vector.shape_cast %204 : vector<1x8x128xf32> to vector<8x128xf32>
    %c22_131 = arith.constant 22 : index
    %c0_132 = arith.constant 0 : index
    %c0_133 = arith.constant 0 : index
    %206 = vector.load %arg2[%c22_131, %c0_132, %c0_133] : memref<32x8x128xf32, #tpu.memory_space<vmem>>, vector<1x8x128xf32>
    %207 = vector.shape_cast %206 : vector<1x8x128xf32> to vector<8x128xf32>
    %208 = arith.subf %205, %207 : vector<8x128xf32>
    %209 = arith.mulf %208, %208 : vector<8x128xf32>
    %210 = arith.addf %203, %209 : vector<8x128xf32>
    %c23 = arith.constant 23 : index
    %c0_134 = arith.constant 0 : index
    %c0_135 = arith.constant 0 : index
    %211 = vector.load %arg1[%c23, %c0_134, %c0_135] : memref<32x8x128xf32, #tpu.memory_space<vmem>>, vector<1x8x128xf32>
    %212 = vector.shape_cast %211 : vector<1x8x128xf32> to vector<8x128xf32>
    %c23_136 = arith.constant 23 : index
    %c0_137 = arith.constant 0 : index
    %c0_138 = arith.constant 0 : index
    %213 = vector.load %arg2[%c23_136, %c0_137, %c0_138] : memref<32x8x128xf32, #tpu.memory_space<vmem>>, vector<1x8x128xf32>
    %214 = vector.shape_cast %213 : vector<1x8x128xf32> to vector<8x128xf32>
    %215 = arith.subf %212, %214 : vector<8x128xf32>
    %216 = arith.mulf %215, %215 : vector<8x128xf32>
    %217 = arith.addf %210, %216 : vector<8x128xf32>
    %c24 = arith.constant 24 : index
    %c0_139 = arith.constant 0 : index
    %c0_140 = arith.constant 0 : index
    %218 = vector.load %arg1[%c24, %c0_139, %c0_140] : memref<32x8x128xf32, #tpu.memory_space<vmem>>, vector<1x8x128xf32>
    %219 = vector.shape_cast %218 : vector<1x8x128xf32> to vector<8x128xf32>
    %c24_141 = arith.constant 24 : index
    %c0_142 = arith.constant 0 : index
    %c0_143 = arith.constant 0 : index
    %220 = vector.load %arg2[%c24_141, %c0_142, %c0_143] : memref<32x8x128xf32, #tpu.memory_space<vmem>>, vector<1x8x128xf32>
    %221 = vector.shape_cast %220 : vector<1x8x128xf32> to vector<8x128xf32>
    %222 = arith.subf %219, %221 : vector<8x128xf32>
    %223 = arith.mulf %222, %222 : vector<8x128xf32>
    %224 = arith.addf %217, %223 : vector<8x128xf32>
    %c25 = arith.constant 25 : index
    %c0_144 = arith.constant 0 : index
    %c0_145 = arith.constant 0 : index
    %225 = vector.load %arg1[%c25, %c0_144, %c0_145] : memref<32x8x128xf32, #tpu.memory_space<vmem>>, vector<1x8x128xf32>
    %226 = vector.shape_cast %225 : vector<1x8x128xf32> to vector<8x128xf32>
    %c25_146 = arith.constant 25 : index
    %c0_147 = arith.constant 0 : index
    %c0_148 = arith.constant 0 : index
    %227 = vector.load %arg2[%c25_146, %c0_147, %c0_148] : memref<32x8x128xf32, #tpu.memory_space<vmem>>, vector<1x8x128xf32>
    %228 = vector.shape_cast %227 : vector<1x8x128xf32> to vector<8x128xf32>
    %229 = arith.subf %226, %228 : vector<8x128xf32>
    %230 = arith.mulf %229, %229 : vector<8x128xf32>
    %231 = arith.addf %224, %230 : vector<8x128xf32>
    %c26 = arith.constant 26 : index
    %c0_149 = arith.constant 0 : index
    %c0_150 = arith.constant 0 : index
    %232 = vector.load %arg1[%c26, %c0_149, %c0_150] : memref<32x8x128xf32, #tpu.memory_space<vmem>>, vector<1x8x128xf32>
    %233 = vector.shape_cast %232 : vector<1x8x128xf32> to vector<8x128xf32>
    %c26_151 = arith.constant 26 : index
    %c0_152 = arith.constant 0 : index
    %c0_153 = arith.constant 0 : index
    %234 = vector.load %arg2[%c26_151, %c0_152, %c0_153] : memref<32x8x128xf32, #tpu.memory_space<vmem>>, vector<1x8x128xf32>
    %235 = vector.shape_cast %234 : vector<1x8x128xf32> to vector<8x128xf32>
    %236 = arith.subf %233, %235 : vector<8x128xf32>
    %237 = arith.mulf %236, %236 : vector<8x128xf32>
    %238 = arith.addf %231, %237 : vector<8x128xf32>
    %c27 = arith.constant 27 : index
    %c0_154 = arith.constant 0 : index
    %c0_155 = arith.constant 0 : index
    %239 = vector.load %arg1[%c27, %c0_154, %c0_155] : memref<32x8x128xf32, #tpu.memory_space<vmem>>, vector<1x8x128xf32>
    %240 = vector.shape_cast %239 : vector<1x8x128xf32> to vector<8x128xf32>
    %c27_156 = arith.constant 27 : index
    %c0_157 = arith.constant 0 : index
    %c0_158 = arith.constant 0 : index
    %241 = vector.load %arg2[%c27_156, %c0_157, %c0_158] : memref<32x8x128xf32, #tpu.memory_space<vmem>>, vector<1x8x128xf32>
    %242 = vector.shape_cast %241 : vector<1x8x128xf32> to vector<8x128xf32>
    %243 = arith.subf %240, %242 : vector<8x128xf32>
    %244 = arith.mulf %243, %243 : vector<8x128xf32>
    %245 = arith.addf %238, %244 : vector<8x128xf32>
    %c28 = arith.constant 28 : index
    %c0_159 = arith.constant 0 : index
    %c0_160 = arith.constant 0 : index
    %246 = vector.load %arg1[%c28, %c0_159, %c0_160] : memref<32x8x128xf32, #tpu.memory_space<vmem>>, vector<1x8x128xf32>
    %247 = vector.shape_cast %246 : vector<1x8x128xf32> to vector<8x128xf32>
    %c28_161 = arith.constant 28 : index
    %c0_162 = arith.constant 0 : index
    %c0_163 = arith.constant 0 : index
    %248 = vector.load %arg2[%c28_161, %c0_162, %c0_163] : memref<32x8x128xf32, #tpu.memory_space<vmem>>, vector<1x8x128xf32>
    %249 = vector.shape_cast %248 : vector<1x8x128xf32> to vector<8x128xf32>
    %250 = arith.subf %247, %249 : vector<8x128xf32>
    %251 = arith.mulf %250, %250 : vector<8x128xf32>
    %252 = arith.addf %245, %251 : vector<8x128xf32>
    %c29 = arith.constant 29 : index
    %c0_164 = arith.constant 0 : index
    %c0_165 = arith.constant 0 : index
    %253 = vector.load %arg1[%c29, %c0_164, %c0_165] : memref<32x8x128xf32, #tpu.memory_space<vmem>>, vector<1x8x128xf32>
    %254 = vector.shape_cast %253 : vector<1x8x128xf32> to vector<8x128xf32>
    %c29_166 = arith.constant 29 : index
    %c0_167 = arith.constant 0 : index
    %c0_168 = arith.constant 0 : index
    %255 = vector.load %arg2[%c29_166, %c0_167, %c0_168] : memref<32x8x128xf32, #tpu.memory_space<vmem>>, vector<1x8x128xf32>
    %256 = vector.shape_cast %255 : vector<1x8x128xf32> to vector<8x128xf32>
    %257 = arith.subf %254, %256 : vector<8x128xf32>
    %258 = arith.mulf %257, %257 : vector<8x128xf32>
    %259 = arith.addf %252, %258 : vector<8x128xf32>
    %cst_169 = arith.constant 0.000000e+00 : f32
    %260 = vector.broadcast %cst_169 : f32 to vector<8x128xf32>
    %261 = arith.select %9, %259, %260 : vector<8x128xi1>, vector<8x128xf32>
    %262 = arith.addf %118, %261 : vector<8x128xf32>
    %c0_170 = arith.constant 0 : index
    %c0_171 = arith.constant 0 : index
    %263 = vector.load %arg4[%c0_170, %c0_171] : memref<1x1xf32, #tpu.memory_space<vmem>>, vector<1x1xf32>
    %264 = vector.shape_cast %262 : vector<8x128xf32> to vector<1x8x128xf32>
    %cst_172 = arith.constant dense<0.000000e+00> : vector<1xf32>
    %265 = vector.multi_reduction <add>, %264, %cst_172 [1, 2] : vector<1x8x128xf32> to vector<1xf32>
    %266 = vector.shape_cast %265 : vector<1xf32> to vector<1x1x1xf32>
    %267 = vector.extract %266[0, 0, 0] : f32 from vector<1x1x1xf32>
    %268 = vector.broadcast %267 : f32 to vector<1x1xf32>
    %269 = arith.addf %263, %268 : vector<1x1xf32>
    %c0_173 = arith.constant 0 : index
    %c0_174 = arith.constant 0 : index
    %270 = vector.load %arg4[%c0_173, %c0_174] : memref<1x1xf32, #tpu.memory_space<vmem>>, vector<1x1xf32>
    tpu.vector_store %arg4[%c0_173, %c0_174], %269 {strides = array<i32>} : memref<1x1xf32, #tpu.memory_space<vmem>>, vector<1x1xf32>,
    %c0_i32_175 = arith.constant 0 : i32
    %271 = arith.cmpi eq, %arg0, %c0_i32_175 : i32
    %272 = arith.extui %271 : i1 to i32
    %c0_i32_176 = arith.constant 0 : i32
    %273 = arith.cmpi ne, %272, %c0_i32_176 : i32
    scf.if %273 {
      %c0_177 = arith.constant 0 : index
      %c0_178 = arith.constant 0 : index
      %274 = vector.load %arg4[%c0_177, %c0_178] : memref<1x1xf32, #tpu.memory_space<vmem>>, vector<1x1xf32>
      %cst_179 = arith.constant 5.000000e-01 : f32
      %275 = vector.broadcast %cst_179 : f32 to vector<1x1xf32>
      %276 = arith.mulf %274, %275 : vector<1x1xf32>
      %c0_180 = arith.constant 0 : index
      %c0_181 = arith.constant 0 : index
      %277 = vector.load %arg3[%c0_180, %c0_181] : memref<1x1xf32, #tpu.memory_space<vmem>>, vector<1x1xf32>
      tpu.vector_store %arg3[%c0_180, %c0_181], %276 {strides = array<i32>} : memref<1x1xf32, #tpu.memory_space<vmem>>, vector<1x1xf32>,
    } else {
    }
    return
  }
  func.func @transform_0(%arg0: i32) -> (i32, i32, i32) {
    %c0_i32 = arith.constant 0 : i32
    %c0_i32_0 = arith.constant 0 : i32
    %c0_i32_1 = arith.constant 0 : i32
    return %c0_i32, %arg0, %c0_i32_0 : i32, i32, i32
  }
  func.func @transform_1(%arg0: i32) -> (i32, i32, i32) {
    %c0_i32 = arith.constant 0 : i32
    %c0_i32_0 = arith.constant 0 : i32
    %c0_i32_1 = arith.constant 0 : i32
    return %c0_i32, %arg0, %c0_i32_0 : i32, i32, i32
  }
  func.func @transform_2(%arg0: i32) -> (i32, i32) {
    %c0_i32 = arith.constant 0 : i32
    %c0_i32_0 = arith.constant 0 : i32
    %c0_i32_1 = arith.constant 0 : i32
    return %c0_i32, %c0_i32_0 : i32, i32
  }
}

</mosaic_0001>

<bundles_post_ra>
// kernel: yolo_loss_pallas.1
= control target key start
LH: loop header
LB: loop body
LE: loop exit
PB: predicated region body
PF: predicated region fallthrough
CT: control target
= control target key end

     0   :  { %v440_v26 = vmov 0.0   ;;  %s823_s0 = inlined_call_operand.vmem [shape: f32[32,8,128], index: 0, kind: input, shape index: {}]   ;;  %s824_s1 = inlined_call_operand.vmem [shape: f32[32,8,128], index: 1, kind: input, shape index: {}]   ;;  %s825_s2 = inlined_call_operand.hbm [shape: f32[1,1], index: 2, kind: output, shape index: {}]  }
   0x1   :  { %v18_v0 = vld [vmem:[%s824_s1] sm:$0xff]  ;;  %v338_v1 = vld [vmem:[%s824_s1 + $0x28] sm:$0xff]  ;;  %v466_v2 = vld [vmem:[%s823_s0 + $0x18] sm:$0xff] }
   0x2   :  { %v471_v3 = vld [vmem:[%s824_s1 + $0x18] sm:$0xff]  ;;  %v473_v4 = vadd.f32 %v338_v1, %v18_v0  ;;  %400 = vrsqrt.f32 %v466_v2  ;;  %v479_v5 = vld [vmem:[%s823_s0 + $0x20] sm:$0xff]  ;;  %vm24_vm1 = vcmp.eq.f32.partialorder %v18_v0, 1.0  ;;  %vm26_vm2 = vcmp.eq.f32.partialorder %v338_v1, 1.0  ;;  %v339_v9 = vld [vmem:[%s823_s0 + $0x28] sm:$0xff] }
   0x3   :  { %402 = vrsqrt.f32 %v471_v3  ;;  %v485_v6 = vld [vmem:[%s824_s1 + $0x20] sm:$0xff]  ;;  %v340_v10 = vld [vmem:[%s823_s0 + $0x8] sm:$0xff]  ;;  %v342_v13 = vld [vmem:[%s823_s0 + $0x10] sm:$0xff]  ;;  %v544_v20 = vsub.f32 %v339_v9, %v338_v1  ;;  %vm58_vm5 = vcmp.eq.f32.partialorder %v466_v2, inf  ;;  %vm60_vm6 = vcmp.eq.f32.partialorder %v466_v2, 0.0 }
   0x4   :  { %vm826_vm0 = vcmp.eq.f32.partialorder %v473_v4, 1.0  ;;  %v34_v7 = vld [vmem:[%s823_s0] sm:$0xff]  ;;  %404 = vrsqrt.f32 %v479_v5  ;;  %v341_v12 = vld [vmem:[%s824_s1 + $0x8] sm:$0xff]  ;;  %v343_v14 = vld [vmem:[%s824_s1 + $0x10] sm:$0xff]  ;;  %v61_v28 = vand.u32 2147483648, %v466_v2  ;;  %vm67_vm7 = vcmp.eq.f32.partialorder %v471_v3, inf }
   0x5   :  { %v495_v8 = vld [vmem:[%s823_s0 + $0x40] sm:$0xff]  ;;  %406 = vrsqrt.f32 %v485_v6  ;;  %vm520_vm3 = vmand %vm826_vm0, %vm24_vm1  ;;  %v528_v16 = vld [vmem:[%s823_s0 + $0x48] sm:$0xff]  ;;  %v536_v18 = vsub.f32 %v34_v7, %v18_v0  ;;  %v48_v21 = vsub.f32 %v340_v10, %v341_v12  ;;  %v53_v22 = vsub.f32 %v342_v13, %v343_v14 }
   0x6   :  { %v507_v11 = vld [vmem:[%s824_s1 + $0x40] sm:$0xff]  ;;  %408 = vrsqrt.f32 %v495_v8  ;;  %vm532_vm4 = vmand %vm826_vm0, %vm26_vm2  ;;  %v542_v19 = vld [vmem:[%s824_s1 + $0x48] sm:$0xff]  ;;  %v556_v27 = vsel %vm520_vm3, 1.0, %v440_v26  ;;  %vm69_vm8 = vcmp.eq.f32.partialorder %v471_v3, 0.0  ;;  %v70_v33 = vand.u32 2147483648, %v471_v3 }
   0x7   :  { %410 = vrsqrt.f32 %v507_v11  ;;  %v348_v23 = vld [vmem:[%s823_s0 + $0x30] sm:$0xff]  ;;  %v358_v30 = vld [vmem:[%s823_s0 + $0x58] sm:$0xff]  ;;  %v574_v32 = vsel %vm532_vm4, 1.0, %v440_v26  ;;  %v360_v35 = vld [vmem:[%s823_s0 + $0x60] sm:$0xff]  ;;  %vm78_vm9 = vcmp.eq.f32.partialorder %v479_v5, inf  ;;  %v81_v38 = vand.u32 2147483648, %v479_v5 }
   0x8   :  { %v356_v24 = vld [vmem:[%s823_s0 + $0x50] sm:$0xff]  ;;  %412 = vrsqrt.f32 %v528_v16  ;;  %v359_v31 = vld [vmem:[%s824_s1 + $0x58] sm:$0xff]  ;;  %v361_v36 = vld [vmem:[%s824_s1 + $0x60] sm:$0xff]  ;;  %vm87_vm10 = vcmp.eq.f32.partialorder %v485_v6, inf  ;;  %v90_v39 = vand.u32 2147483648, %v485_v6  ;;  %v596_v42 = vmul.f32 %v48_v21, %v48_v21 }
   0x9   :  { %v357_v29 = vld [vmem:[%s824_s1 + $0x50] sm:$0xff]  ;;  %414 = vrsqrt.f32 %v542_v19  ;;  %v362_v40 = vld [vmem:[%s823_s0 + $0x68] sm:$0xff]  ;;  %v173_v44 = vsub.f32 %v358_v30, %v359_v31  ;;  %vm80_vm11 = vcmp.eq.f32.partialorder %v479_v5, 0.0  ;;  %v608_v49 = vmul.f32 %v53_v22, %v53_v22  ;;  %v366_v63 = vld [vmem:[%s823_s0 + $0x78] sm:$0xff] }
   0xa   :  { %v349_v34 = vld [vmem:[%s824_s1 + $0x30] sm:$0xff]  ;;  %v166_v43 = vsub.f32 %v356_v24, %v357_v29  ;;  %v363_v45 = vld [vmem:[%s824_s1 + $0x68] sm:$0xff]  ;;  %vm117_vm12 = vcmp.eq.f32.partialorder %v495_v8, inf  ;;  %v180_v51 = vsub.f32 %v360_v35, %v361_v36  ;;  %vm89_vm13 = vcmp.eq.f32.partialorder %v485_v6, 0.0  ;;  %v367_v0 = vld [vmem:[%s824_s1 + $0x78] sm:$0xff] }
   0xb   :  { %v364_v46 = vld [vmem:[%s823_s0 + $0x70] sm:$0xff]  ;;  %v610_v50 = vsub.f32 %v348_v23, %v349_v34  ;;  %vm119_vm14 = vcmp.eq.f32.partialorder %v495_v8, 0.0  ;;  %v174_v55 = vmul.f32 %v173_v44, %v173_v44  ;;  %v120_v56 = vand.u32 2147483648, %v495_v8 }
   0xc   :  { %v401_v25 = vpop.eup %400  ;;  %v365_v47 = vld [vmem:[%s824_s1 + $0x70] sm:$0xff]  ;;  %v167_v54 = vmul.f32 %v166_v43, %v166_v43  ;;  %v181_v57 = vmul.f32 %v180_v51, %v180_v51  ;;  %v187_v58 = vsub.f32 %v362_v40, %v363_v45  ;;  %vm126_vm15 = vcmp.eq.f32.partialorder %v507_v11, inf }
   0xd   :  { %v403_v37 = vpop.eup %402  ;;  %v57_v41 = vmul.f32 %v401_v25, %v466_v2  ;;  %v194_v59 = vsub.f32 %v364_v46, %v365_v47  ;;  %vm128_vm1 = vcmp.eq.f32.partialorder %v507_v11, 0.0 }
   0xe   :  { %v405_v48 = vpop.eup %404  ;;  %v66_v53 = vmul.f32 %v403_v37, %v471_v3  ;;  %v175_v62 = vadd.f32 %v174_v55, %v167_v54 }
   0xf   :  { %v407_v52 = vpop.eup %406  ;;  %v59_v61 = vsel %vm58_vm5, %v466_v2, %v57_v41 }
  0x10   :  { %v409_v60 = vpop.eup %408 }
  0x11   :  { %7 = vsyncpa [#allocation4], 0  ;;  %v411_v1 = vpop.eup %410  ;;  %vm23_vm2 = vcmp.eq.f32.partialorder %v473_v4, 0.0  ;;  %v77_v7 = vmul.f32 %v405_v48, %v479_v5  ;;  %v86_v9 = vmul.f32 %v407_v52, %v485_v6  ;;  %v116_v10 = vmul.f32 %v409_v60, %v495_v8  ;;  %v368_v29 = vld [vmem:[%s823_s0 + $0x80] sm:$0xff]  ;;  %v370_v37 = vld [vmem:[%s823_s0 + $0x88] sm:$0xff] }
  0x12   :  { %v188_v12 = vmul.f32 %v187_v58, %v187_v58  ;;  %v68_v13 = vsel %vm67_vm7, %v471_v3, %v66_v53  ;;  %v125_v14 = vmul.f32 %v411_v1, %v507_v11  ;;  %v182_v21 = vadd.f32 %v181_v57, %v175_v62  ;;  %v413_v23 = vpop.eup %412  ;;  %v369_v36 = vld [vmem:[%s824_s1 + $0x80] sm:$0xff]  ;;  %v371_v40 = vld [vmem:[%s824_s1 + $0x88] sm:$0xff]  ;;  %v372_v44 = vld [vmem:[%s823_s0 + $0x90] sm:$0xff] }
  0x13   :  { %v195_v22 = vmul.f32 %v194_v59, %v194_v59  ;;  %v129_v24 = vand.u32 2147483648, %v507_v11  ;;  %vm137_vm5 = vcmp.eq.f32.partialorder %v528_v16, inf  ;;  %vm139_vm0 = vcmp.eq.f32.partialorder %v528_v16, 0.0  ;;  %v415_v30 = vpop.eup %414  ;;  %v373_v3 = vld [vmem:[%s824_s1 + $0x90] sm:$0xff]  ;;  %v374_v53 = vld [vmem:[%s823_s0 + $0x98] sm:$0xff]  ;;  %v376_v60 = vld [vmem:[%s823_s0 + $0xa0] sm:$0xff] }
  0x14   :  { %v201_v25 = vsub.f32 %v366_v63, %v367_v0  ;;  %v62_v31 = vsel %vm60_vm6, %v61_v28, %v59_v61  ;;  %v140_v34 = vand.u32 2147483648, %v528_v16  ;;  %vm146_vm7 = vcmp.eq.f32.partialorder %v542_v19, inf  ;;  %v375_v54 = vld [vmem:[%s824_s1 + $0x98] sm:$0xff]  ;;  %v377_v61 = vld [vmem:[%s824_s1 + $0xa0] sm:$0xff] }
  0x15   :  { %v189_v35 = vadd.f32 %v188_v12, %v182_v21  ;;  %v71_v2 = vsel %vm69_vm8, %v70_v33, %v68_v13  ;;  %v79_v28 = vsel %vm78_vm9, %v479_v5, %v77_v7  ;;  %v88_v41 = vsel %vm87_vm10, %v485_v6, %v86_v9  ;;  %v350_v5 = vld [vmem:[%s823_s0 + $0x38] sm:$0xff] }
  0x16   :  { %v118_v43 = vsel %vm117_vm12, %v495_v8, %v116_v10  ;;  %v127_v33 = vsel %vm126_vm15, %v507_v11, %v125_v14  ;;  %v136_v45 = vmul.f32 %v413_v23, %v528_v16  ;;  %v202_v47 = vmul.f32 %v201_v25, %v201_v25  ;;  %v378_v10 = vld [vmem:[%s823_s0 + $0xa8] sm:$0xff]  ;;  %v381_v25 = vld [vmem:[%s824_s1 + $0xb0] sm:$0xff] }
  0x17   :  { %v196_v46 = vadd.f32 %v195_v22, %v189_v35  ;;  %v145_v48 = vmul.f32 %v415_v30, %v542_v19  ;;  %vm148_vm6 = vcmp.eq.f32.partialorder %v542_v19, 0.0  ;;  %v208_v51 = vsub.f32 %v368_v29, %v369_v36  ;;  %v379_v8 = vld [vmem:[%s824_s1 + $0xa8] sm:$0xff] }
  0x18   :  { %v215_v52 = vsub.f32 %v370_v37, %v371_v40  ;;  %v72_v55 = vsub.f32 %v62_v31, %v71_v2  ;;  %v82_v57 = vsel %vm80_vm11, %v81_v38, %v79_v28  ;;  %v222_v59 = vsub.f32 %v372_v44, %v373_v3  ;;  %v351_v38 = vld [vmem:[%s824_s1 + $0x38] sm:$0xff]  ;;  %v384_v44 = vld [vmem:[%s823_s0 + $0xc0] sm:$0xff] }
  0x19   :  { %v203_v58 = vadd.f32 %v202_v47, %v196_v46  ;;  %v91_v62 = vsel %vm89_vm13, %v90_v39, %v88_v41  ;;  %v121_v63 = vsel %vm119_vm14, %v120_v56, %v118_v43  ;;  %v130_v0 = vsel %vm128_vm1, %v129_v24, %v127_v33  ;;  %v380_v24 = vld [vmem:[%s823_s0 + $0xb0] sm:$0xff]  ;;  %v382_v2 = vld [vmem:[%s823_s0 + $0xb8] sm:$0xff]  ;;  %v385_v3 = vld [vmem:[%s824_s1 + $0xc0] sm:$0xff] }
  0x1a   :  { %v209_v1 = vmul.f32 %v208_v51, %v208_v51  ;;  %v138_v6 = vsel %vm137_vm5, %v528_v16, %v136_v45  ;;  %v149_v39 = vand.u32 2147483648, %v542_v19  ;;  %v216_v7 = vmul.f32 %v215_v52, %v215_v52  ;;  %v383_v28 = vld [vmem:[%s824_s1 + $0xb8] sm:$0xff]  ;;  %v387_v51 = vld [vmem:[%s824_s1 + $0xc8] sm:$0xff] }
  0x1b   :  { %v229_v9 = vsub.f32 %v374_v53, %v375_v54  ;;  %v147_v11 = vsel %vm146_vm7, %v542_v19, %v145_v48  ;;  %v223_v12 = vmul.f32 %v222_v59, %v222_v59  ;;  %v236_v13 = vsub.f32 %v376_v60, %v377_v61  ;;  %v386_v48 = vld [vmem:[%s823_s0 + $0xc8] sm:$0xff]  ;;  %v388_v61 = vld [vmem:[%s823_s0 + $0xd0] sm:$0xff] }
  0x1c   :  { %v210_v56 = vadd.f32 %v209_v1, %v203_v58  ;;  %v29_v14 = vsel %vm23_vm2, 0.5, %v556_v27  ;;  %v92_v21 = vsub.f32 %v82_v57, %v91_v62  ;;  %v112_v22 = vsub.f32 %v350_v5, %v351_v38  ;;  %v389_v62 = vld [vmem:[%s824_s1 + $0xd0] sm:$0xff]  ;;  %v390_v1 = vld [vmem:[%s823_s0 + $0xd8] sm:$0xff] }
  0x1d   :  { %v131_v23 = vsub.f32 %v121_v63, %v130_v0  ;;  %v73_v29 = vsel %vm520_vm3, %v72_v55, 0.0  ;;  %v230_v31 = vmul.f32 %v229_v9, %v229_v9  ;;  %v243_v35 = vsub.f32 %v378_v10, %v379_v8 }
  0x1e   :  { %v217_v30 = vadd.f32 %v216_v7, %v210_v56  ;;  %v31_v27 = vsel %vm23_vm2, 0.5, %v574_v32  ;;  %v96_v36 = vadd.f32 %v608_v49, %v596_v42  ;;  %v141_v37 = vsel %vm139_vm0, %v140_v34, %v138_v6  ;;  %v391_v6 = vld [vmem:[%s824_s1 + $0xd8] sm:$0xff] }
  0x1f   :  { %v150_v40 = vsel %vm148_vm6, %v149_v39, %v147_v11  ;;  %v153_v32 = vmul.f32 %v610_v50, %v610_v50  ;;  %v237_v43 = vmul.f32 %v236_v13, %v236_v13  ;;  %v250_v42 = vsub.f32 %v380_v24, %v381_v25  ;;  %v392_v13 = vld [vmem:[%s823_s0 + $0xe0] sm:$0xff]  ;;  %v395_v24 = vld [vmem:[%s824_s1 + $0xe8] sm:$0xff] }
  0x20   :  { %v224_v41 = vadd.f32 %v223_v12, %v217_v30  ;;  %v93_v16 = vsel %vm520_vm3, %v92_v21, 0.0  ;;  %v97_v49 = vmul.f32 %v73_v29, %v73_v29  ;;  %v132_v19 = vsel %vm532_vm4, %v131_v23, 0.0 }
  0x21   :  { %v154_v34 = vmul.f32 %v112_v22, %v112_v22  ;;  %v151_v50 = vsub.f32 %v141_v37, %v150_v40  ;;  %v244_v45 = vmul.f32 %v243_v35, %v243_v35  ;;  %v257_v46 = vsub.f32 %v382_v2, %v383_v28 }
  0x22   :  { %v231_v33 = vadd.f32 %v230_v31, %v224_v41  ;;  %v39_v47 = vmul.f32 %v536_v18, %v29_v14  ;;  %v41_v52 = vmul.f32 %v544_v20, %v31_v27  ;;  %v251_v54 = vmul.f32 %v250_v42, %v250_v42  ;;  %v393_v14 = vld [vmem:[%s824_s1 + $0xe0] sm:$0xff]  ;;  %s441_s1 = smov [#allocation3]  }
  0x23   :  { %v264_v55 = vsub.f32 %v384_v44, %v385_v3  ;;  %v98_v57 = vadd.f32 %v97_v49, %v96_v36  ;;  %v99_v58 = vmul.f32 %v93_v16, %v93_v16  ;;  %v155_v59 = vadd.f32 %v154_v34, %v153_v32  ;;  %s330_s17 = sshll.u32 %s441_s1, 4  ;;  %s331_s17 = int_to_ptr.vmem [resolvable:$true] %s330_s17 }
  0x24   :  { %v238_v53 = vadd.f32 %v237_v43, %v231_v33  ;;  %v156_v60 = vmul.f32 %v132_v19, %v132_v19  ;;  %v152_v5 = vsel %vm532_vm4, %v151_v50, 0.0  ;;  %v258_v63 = vmul.f32 %v257_v46, %v257_v46  ;;  %s416_s18 = scalar_lea.vmem %s331_s17, 16  ;;  %s420_s19 = scalar_lea.vmem %s331_s17, 32 }
  0x25   :  { %v271_v0 = vsub.f32 %v386_v48, %v387_v51  ;;  %v40_v39 = vmul.f32 %v39_v47, %v536_v18  ;;  %v265_v9 = vmul.f32 %v264_v55, %v264_v55  ;;  %v278_v10 = vsub.f32 %v388_v61, %v389_v62  ;;  %p417_p0 = scmp.ne.s32.totalorder %s331_s17, %s416_s18  ;;  %p421_p1 = scmp.lt.s32.totalorder %s331_s17, %s331_s17 }
  0x26   :  { %v245_v38 = vadd.f32 %v244_v45, %v238_v53  ;;  %v42_v8 = vmul.f32 %v41_v52, %v544_v20  ;;  %v100_v11 = vadd.f32 %v99_v58, %v98_v57  ;;  %v157_v56 = vadd.f32 %v156_v60, %v155_v59  ;;  %v394_v20 = vld [vmem:[%s823_s0 + $0xe8] sm:$0xff]  ;;  %p422_p2 = scmp.lt.s32.totalorder %s420_s19, %s416_s18 }
  0x27   :  { %v158_v12 = vmul.f32 %v152_v5, %v152_v5  ;;  %v32_v18 = vsel %vm520_vm3, 5.0, %v440_v26  ;;  %v272_v22 = vmul.f32 %v271_v0, %v271_v0  ;;  %v285_v23 = vsub.f32 %v390_v1, %v391_v6 }
  0x28   :  { %v252_v7 = vadd.f32 %v251_v54, %v245_v38  ;;  %v279_v29 = vmul.f32 %v278_v10, %v278_v10  ;;  %v292_v30 = vsub.f32 %v392_v13, %v393_v14  ;;  %v43_v31 = vadd.f32 %v42_v8, %v40_v39  ;;  %p423_p3 = por %p422_p2, %p421_p1 }
  0x29   :  { %v101_v35 = vmul.f32 %v100_v11, %v32_v18  ;;  %v159_v27 = vadd.f32 %v158_v12, %v157_v56  ;;  %v33_v15 = vsel %vm532_vm4, 5.0, %v440_v26  ;;  %v286_v37 = vmul.f32 %v285_v23, %v285_v23 }
  0x2a   :  { %v259_v21 = vadd.f32 %v258_v63, %v252_v7  ;;  %v299_v40 = vsub.f32 %v394_v20, %v395_v24  ;;  %v293_v28 = vmul.f32 %v292_v30, %v292_v30  ;;  %vm831_vm0 = vcmp.eq.f32.partialorder %v473_v4, 1.0  ;;  %p424_p4 = pnand %p423_p3, %p417_p0 }
  0x2b   :  { %v102_v32 = vadd.f32 %v101_v35, %v43_v31  ;;  %v160_v41 = vmul.f32 %v159_v27, %v33_v15  ;;  %vm16_vm3 = vcmask 0  }
  0x2c   :  { %v266_v25 = vadd.f32 %v265_v9, %v259_v21  ;;  %v300_v42 = vmul.f32 %v299_v40, %v299_v40  ;;  %17 = vst.msk [vmem:[#allocation2] sm:$0x1] %vm16_vm3, %v440_v26 }
  0x2d   :  { %v161_v49 = vadd.f32 %v160_v41, %v102_v32 }
  0x2e   :  { %v273_v36 = vadd.f32 %v272_v22, %v266_v25 }
  0x30   :  { %v280_v2 = vadd.f32 %v279_v29, %v273_v36 }
  0x32   :  { %v287_v43 = vadd.f32 %v286_v37, %v280_v2 }
  0x33   :  { %v304_v48 = vld [vmem:[#allocation2] sm:$0x1] }
  0x34   :  { %v294_v16 = vadd.f32 %v293_v28, %v287_v43 }
  0x36   :  { %v301_v19 = vadd.f32 %v300_v42, %v294_v16 }
  0x38   :  { %v302_v34 = vsel %vm831_vm0, %v301_v19, 0.0 }
  0x39   :  { %v303_v44 = vadd.f32 %v302_v34, %v161_v49 }
  0x3b   :  { %305 = vadd.xlane.f32.xlu0 %v303_v44 }
  0xc8   :  { %v306_v17 = vpop.xlane.xlu0 %305 }
  0xc9   :  { %v307_v3 = vrot.slane %v306_v17, 4 }
  0xcb   :  { %v308_v50 = vadd.f32 %v307_v3, %v306_v17 }
  0xcd   :  { %v309_v33 = vrot.slane %v308_v50, 2 }
  0xcf   :  { %v310_v45 = vadd.f32 %v309_v33, %v308_v50 }
  0xd1   :  { %v311_v46 = vrot.slane %v310_v45, 1 }
  0xd3   :  { %v312_v47 = vadd.f32 %v311_v46, %v310_v45 }
  0xd5   :  { %396 = vpush %v312_v47 }
 0x106   :  { %s397_s0 = spop %396 }
 0x107   :  { %v314_v51 = vstv %s397_s0 }
 0x108   :  { %v315_v52 = vadd.f32 %v314_v51, %v304_v48 }
 0x10a   :  { %317 = vst.msk [vmem:[#allocation2] sm:$0x1] %vm16_vm3, %v315_v52 }
 0x111   :  { %v321_v4 = vld [vmem:[#allocation2] sm:$0x1] }
 0x112   :  { %v322_v53 = vmul.f32 0.5, %v321_v4 }
 0x114   :  { %323 = vst.msk [vmem:[#allocation3] sm:$0x1] %vm16_vm3, %v322_v53 }
 0x115   :  { %427 = shalt.err (!%p424_p4)
}
 0x116   :  { %s428_s22 = scalar_lea.hbm %s825_s2, 16 }
 0x117   :  { %p429_p5 = scmp.ne.s32.totalorder %s825_s2, %s428_s22  ;;  %p432_p6 = scmp.lt.u32.totalorder %s428_s22, %s825_s2 }
 0x119   :  { %p434_p7 = pnand %p432_p6, %p429_p5 }
 0x11b   :  { %437 = shalt.err (!%p434_p7)
}
 0x11c   :  { %333 = dma.vmem_to_hbm [thread:$0]  %s331_s17, 16, %s825_s2, [#allocation4]  }
 0x11d   :  { %438 = dma.done.wait [#allocation4], 16  }
 0x11e   :  { %439 = vsyncadd [#allocation4], 4294967280 }
 0x11f   :  { %337 = vsyncpa [#allocation4], 1 }

</bundles_post_ra>
